<compile_context>
chip_gen: v7x
topology: tpu7x:2x2x1
jax: 0.10.0
libtpu: 0.0.40
codegen_flags: <defaults>
</compile_context>

<pallas_src>
import math

import jax
import jax.numpy as jnp
from jax.experimental import pallas as pl
from jax.experimental.pallas import tpu as pltpu


def _round_up(x, m):
    return ((x + m - 1) // m) * m


# ----------------------------- Pallas kernel --------------------------------

def _psp_bottleneck_kernel(x_ref, interp_ref, prior_ref, w_ref, b_ref, o_ref):
    """relu(x @ W_id + interp @ prior + bias) for one (tm, OUT_pad) output tile.

    x_ref      : (1, tm, C)            bf16   identity-branch activations
    interp_ref : (tm, S_pad)           bf16   bilinear interpolation rows
    prior_ref  : (1, S_pad, OUT_pad)   bf16   pooled+folded pyramid priors (per image)
    w_ref      : (C, OUT_pad)          bf16   identity-branch bottleneck weights
    b_ref      : (1, OUT_pad)          f32    bottleneck bias
    o_ref      : (1, tm, OUT_pad)      bf16
    """
    acc = jnp.dot(x_ref[0], w_ref[...], preferred_element_type=jnp.float32)
    acc = acc + jnp.dot(interp_ref[...], prior_ref[0],
                        preferred_element_type=jnp.float32)
    o_ref[0] = jnp.maximum(acc + b_ref[...], 0.0).astype(o_ref.dtype)


def _vmem_capacity_bytes():
    try:
        return int(pltpu.get_tpu_info().vmem_capacity_bytes)
    except Exception:
        return 64 * 1024 * 1024          # conservative fallback (v7x per-core VMEM)


def _pick_tm_and_limit(m_img, c, s_pad, out_pad):
    """Largest row tile whose double-buffered working set fits this chip's VMEM."""
    cap = _vmem_capacity_bytes()
    budget = int(cap * 0.75)

    def working_set(tm):
        return (2 * tm * c * 2              # feats tiles, bf16, double-buffered
                + 2 * tm * s_pad * 2        # interp tiles, bf16, double-buffered
                + 2 * s_pad * out_pad * 2   # resident prior block, bf16
                + 2 * c * out_pad * 2       # identity weight (conservative: 2 bufs)
                + 2 * out_pad * 4           # bias, f32
                + 2 * tm * out_pad * 2)     # output tiles, bf16, double-buffered

    if m_img <= 128:
        tm = m_img                          # full-extent block (always legal)
    else:
        tm = 128
        for cand in (1024, 512, 256, 128):  # multiples of 16 (bf16 sublane pack)
            if cand <= m_img and working_set(cand) <= budget:
                tm = cand
                break
    limit = int(min(max(2 * working_set(tm), 32 * 1024 * 1024), cap * 0.9))
    return tm, limit


def fused_psp_bottleneck(feats2d, interp, priors, w_id, bias2d):
    """relu(feats2d[n] @ w_id + interp @ priors[n] + bias) per image.

    feats2d : (N, M_img, C)         bf16
    interp  : (M_img, S_pad)        bf16
    priors  : (N, S_pad, OUT_pad)   bf16
    w_id    : (C, OUT_pad)          bf16
    bias2d  : (1, OUT_pad)          f32
    returns : (N, M_img, OUT_pad)   bf16
    """
    N, m_img, C = feats2d.shape
    mi2, s_pad = interp.shape
    n2, s2, out_pad = priors.shape
    assert mi2 == m_img and n2 == N and s2 == s_pad and out_pad % 128 == 0

    tm, vmem_limit = _pick_tm_and_limit(m_img, C, s_pad, out_pad)
    grid = (N, pl.cdiv(m_img, tm))

    def build(single_buffer_weights):
        def const_spec(shape, idx):
            # Constant-index weight/bias: never re-DMA'd, so one buffer suffices.
            if single_buffer_weights:
                return pl.BlockSpec(shape, idx, pipeline_mode=pl.Buffered(1))
            return pl.BlockSpec(shape, idx)

        in_specs = [
            pl.BlockSpec((1, tm, C), lambda n, i: (n, i, 0)),           # feats
            pl.BlockSpec((tm, s_pad), lambda n, i: (i, 0)),             # interp rows
            pl.BlockSpec((1, s_pad, out_pad), lambda n, i: (n, 0, 0)),  # priors
            const_spec((C, out_pad), lambda n, i: (0, 0)),              # W_id
            const_spec((1, out_pad), lambda n, i: (0, 0)),              # bias
        ]
        out_spec = pl.BlockSpec((1, tm, out_pad), lambda n, i: (n, i, 0))

        return pl.pallas_call(
            _psp_bottleneck_kernel,
            out_shape=jax.ShapeDtypeStruct((N, m_img, out_pad), jnp.bfloat16),
            grid_spec=pltpu.PrefetchScalarGridSpec(
                num_scalar_prefetch=0,
                grid=grid,
                in_specs=in_specs,
                out_specs=out_spec,
            ),
            compiler_params=pltpu.CompilerParams(
                dimension_semantics=("parallel", "parallel"),
                vmem_limit_bytes=vmem_limit,
            ),
        )

    args = (feats2d, interp, priors, w_id, bias2d)
    if hasattr(pl, "Buffered"):
        try:
            return build(True)(*args)
        except Exception:
            pass  # pipeline_mode / Buffered(1) unsupported here: plain double-buffer
    return build(False)(*args)


# ------------------------------- JAX glue ------------------------------------

def adaptive_avg_pool_nhwc(x, size):
    """Exact nn.AdaptiveAvgPool2d((size,size)) semantics. x: (N,H,W,C)."""
    N, H, W, C = x.shape

    def bins(L, s):
        return [(int(math.floor(i * L / s)), int(math.ceil((i + 1) * L / s)))
                for i in range(s)]

    rows = []
    for hs, he in bins(H, size):
        cols = []
        for ws, we in bins(W, size):
            cols.append(jnp.mean(x[:, hs:he, ws:we, :], axis=(1, 2)))  # (N,C)
        rows.append(jnp.stack(cols, axis=1))  # (N,size,C)
    return jnp.stack(rows, axis=1)  # (N,size,size,C)


def _bilinear_coords(out_size, in_size):
    """F.interpolate(mode='bilinear', align_corners=False) source coordinates."""
    # TODO(synk): very old PyTorch F.upsample used align_corners=True semantics;
    # switch the coord transform here if matching such a checkpoint bit-for-bit.
    o = jnp.arange(out_size, dtype=jnp.float32)
    src = jnp.clip((o + 0.5) * (in_size / out_size) - 0.5, 0.0, in_size - 1)
    i0 = jnp.floor(src).astype(jnp.int32)
    i1 = jnp.minimum(i0 + 1, in_size - 1)
    frac = src - i0.astype(jnp.float32)
    return i0, i1, frac


def _bilinear_matrix(out_size, in_size):
    """(out_size, in_size) interpolation weights for 1-D bilinear resize."""
    i0, i1, frac = _bilinear_coords(out_size, in_size)
    rows = jnp.arange(out_size)
    w = jnp.zeros((out_size, in_size), jnp.float32)
    w = w.at[rows, i0].add(1.0 - frac)
    w = w.at[rows, i1].add(frac)
    return w


def upsample_bilinear_nhwc(x, H, W):
    """Reference-path bilinear upsample (align_corners=False). x:(N,h,w,C)."""
    N, h, w, C = x.shape
    y0, y1, fy = _bilinear_coords(H, h)
    x0, x1, fx = _bilinear_coords(W, w)
    top = x[:, y0, :, :]
    bot = x[:, y1, :, :]
    fy = fy[None, :, None, None]
    rows = top * (1.0 - fy) + bot * fy          # (N,H,w,C)
    left = rows[:, :, x0, :]
    right = rows[:, :, x1, :]
    fx = fx[None, None, :, None]
    return left * (1.0 - fx) + right * fx       # (N,H,W,C)


def psp_module_forward(feats_nchw, stage_weights, bottleneck_w, bottleneck_b,
                       sizes=(1, 2, 3, 6)):
    """PSPModule.forward.

    feats_nchw     : (N, C, H, W)                 float32
    stage_weights  : list of (C, C)               1x1 conv weights (out,in), no bias
    bottleneck_w   : (OUT, C*(len(sizes)+1))      1x1 conv weight (out,in)
    bottleneck_b   : (OUT,)
    returns        : (N, OUT, H, W)
    """
    N, C, H, W = feats_nchw.shape
    OUT = bottleneck_w.shape[0]
    n_stages = len(sizes)
    out_pad = _round_up(OUT, 128)
    m_img = H * W
    hi = jax.lax.Precision.HIGHEST

    feats = jnp.transpose(feats_nchw, (0, 2, 3, 1))  # NHWC, f32

    # Pooled priors with (stage conv . bottleneck block) folded in, at pooled
    # resolution -- all tiny (s <= 6), kept in f32 until the final cast.
    prior_rows = []
    interp_blocks = []
    for si, s in enumerate(sizes):
        pooled = adaptive_avg_pool_nhwc(feats, s).reshape(N, s * s, C)      # f32
        wb = bottleneck_w[:, si * C:(si + 1) * C]                           # (OUT, C)
        w_fold = jnp.dot(stage_weights[si].T, wb.T, precision=hi)           # (C, OUT)
        prior_rows.append(jnp.einsum('npc,co->npo', pooled, w_fold,
                                     precision=hi))                         # (N,s*s,OUT)
        wy = _bilinear_matrix(H, s)                                         # (H, s)
        wx = _bilinear_matrix(W, s)                                         # (W, s)
        interp_blocks.append(
            jnp.einsum('hi,wj->hwij', wy, wx).reshape(m_img, s * s))

    priors = jnp.concatenate(prior_rows, axis=1)        # (N, S_tot, OUT)
    interp = jnp.concatenate(interp_blocks, axis=1)     # (M_img, S_tot)
    s_tot = priors.shape[1]
    s_pad = _round_up(s_tot, 128)

    priors = jnp.pad(priors, ((0, 0), (0, s_pad - s_tot), (0, out_pad - OUT)))
    interp = jnp.pad(interp, ((0, 0), (0, s_pad - s_tot)))

    w_id = jnp.pad(bottleneck_w[:, n_stages * C:].T,                        # (C, OUT)
                   ((0, 0), (0, out_pad - OUT)))
    bias2d = jnp.pad(bottleneck_b, (0, out_pad - OUT)).reshape(1, out_pad)

    out3d = fused_psp_bottleneck(
        feats.reshape(N, m_img, C).astype(jnp.bfloat16),
        interp.astype(jnp.bfloat16),
        priors.astype(jnp.bfloat16),
        w_id.astype(jnp.bfloat16),
        bias2d.astype(jnp.float32),
    )                                                    # (N, M_img, out_pad) bf16

    out = out3d[:, :, :OUT].reshape(N, H, W, OUT)
    # TODO(synk): return NHWC / bf16 directly if the consumer accepts it -- the
    # NCHW + f32 conversion below costs a full extra HBM round trip; kept here to
    # match the PyTorch module's output contract.
    return jnp.transpose(out, (0, 3, 1, 2)).astype(feats_nchw.dtype)


# ----------------------- pure-JAX reference (f32) ----------------------------

def psp_reference(feats_nchw, stage_weights, bottleneck_w, bottleneck_b, sizes):
    N, C, H, W = feats_nchw.shape
    feats = jnp.transpose(feats_nchw, (0, 2, 3, 1))
    priors = []
    for s, ws in zip(sizes, stage_weights):
        pooled = adaptive_avg_pool_nhwc(feats, s)
        conv = pooled @ ws.T                       # stage 1x1 conv, no bias
        priors.append(upsample_bilinear_nhwc(conv, H, W))
    priors.append(feats)
    x = jnp.concatenate(priors, axis=-1)           # (N,H,W,5C)
    y = jnp.maximum(x @ bottleneck_w.T + bottleneck_b, 0.0)
    return jnp.transpose(y, (0, 3, 1, 2))


# --------------------------------- main --------------------------------------

if __name__ == "__main__":
    key = jax.random.PRNGKey(0)
    N, C, H, W = 2, 4, 16, 16
    OUT = 64
    sizes = (1, 2, 3, 6)

    keys = jax.random.split(key, 3 + len(sizes))
    feats = jax.random.normal(keys[0], (N, C, H, W), jnp.float32)

    stage_weights = [
        jax.random.normal(keys[3 + i], (C, C), jnp.float32) * (1.0 / math.sqrt(C))
        for i in range(len(sizes))
    ]
    bottleneck_w = jax.random.normal(
        keys[1], (OUT, C * (len(sizes) + 1)), jnp.float32
    ) * (1.0 / math.sqrt(C * (len(sizes) + 1)))
    bottleneck_b = jax.random.normal(keys[2], (OUT,), jnp.float32) * 0.01

    out = psp_module_forward(feats, stage_weights, bottleneck_w, bottleneck_b, sizes)
    jax.block_until_ready(out)
    assert out.shape == (N, OUT, H, W)

    ref = psp_reference(feats, stage_weights, bottleneck_w, bottleneck_b, sizes)
    err = float(jnp.max(jnp.abs(out - ref)))
    assert err < 0.1, f"max abs error vs f32 reference too large: {err}"

    print("KERNEL_OK")
</pallas_src>

<mosaic_0001>
module attributes {stable_mosaic.version = 11 : i64} {
  func.func @_psp_bottleneck_kernel(%arg0: i32, %arg1: i32, %arg2: memref<1x256x4xbf16, #tpu.memory_space<vmem>>, %arg3: memref<256x128xbf16, #tpu.memory_space<vmem>>, %arg4: memref<1x128x128xbf16, #tpu.memory_space<vmem>>, %arg5: memref<4x128xbf16, #tpu.memory_space<vmem>>, %arg6: memref<1x128xf32, #tpu.memory_space<vmem>>, %arg7: memref<1x256x128xbf16, #tpu.memory_space<vmem>>) attributes {dimension_semantics = [#tpu.dimension_semantics<parallel>, #tpu.dimension_semantics<parallel>], iteration_bounds = array<i64: 2, 1>, scalar_prefetch = 0 : i64, scratch_operands = 0 : i64, tpu.core_type = #tpu.core_type<tc>, window_params = [{transform_indices = @transform_0, window_bounds = array<i64: 1, 256, 4>}, {transform_indices = @transform_1, window_bounds = array<i64: 256, 128>}, {transform_indices = @transform_2, window_bounds = array<i64: 1, 128, 128>}, {pipeline_mode = #tpu.pipeline_mode<synchronous>, transform_indices = @transform_3, window_bounds = array<i64: 4, 128>}, {pipeline_mode = #tpu.pipeline_mode<synchronous>, transform_indices = @transform_4, window_bounds = array<i64: 1, 128>}, {transform_indices = @transform_5, window_bounds = array<i64: 1, 256, 128>}]} {
    %c0 = arith.constant 0 : index
    %c0_0 = arith.constant 0 : index
    %c0_1 = arith.constant 0 : index
    %0 = vector.load %arg2[%c0, %c0_0, %c0_1] : memref<1x256x4xbf16, #tpu.memory_space<vmem>>, vector<1x256x4xbf16>
    %1 = vector.shape_cast %0 : vector<1x256x4xbf16> to vector<256x4xbf16>
    %c0_2 = arith.constant 0 : index
    %c0_3 = arith.constant 0 : index
    %2 = vector.load %arg5[%c0_2, %c0_3] : memref<4x128xbf16, #tpu.memory_space<vmem>>, vector<4x128xbf16>
    %cst = arith.constant dense<0.000000e+00> : vector<256x128xf32>
    %3 = tpu.matmul %1, %2, %cst {dimension_numbers = #tpu.dot_dimension_numbers<[1], [0], [0], [1], [0, 0, 1, 1], [], []>} : vector<256x4xbf16>, vector<4x128xbf16>, vector<256x128xf32> -> vector<256x128xf32>
    %c0_4 = arith.constant 0 : index
    %c0_5 = arith.constant 0 : index
    %4 = vector.load %arg3[%c0_4, %c0_5] : memref<256x128xbf16, #tpu.memory_space<vmem>>, vector<256x128xbf16>
    %c0_6 = arith.constant 0 : index
    %c0_7 = arith.constant 0 : index
    %c0_8 = arith.constant 0 : index
    %5 = vector.load %arg4[%c0_6, %c0_7, %c0_8] : memref<1x128x128xbf16, #tpu.memory_space<vmem>>, vector<1x128x128xbf16>
    %6 = vector.shape_cast %5 : vector<1x128x128xbf16> to vector<128x128xbf16>
    %cst_9 = arith.constant dense<0.000000e+00> : vector<256x128xf32>
    %7 = tpu.matmul %4, %6, %cst_9 {dimension_numbers = #tpu.dot_dimension_numbers<[1], [0], [0], [1], [0, 0, 1, 1], [], []>} : vector<256x128xbf16>, vector<128x128xbf16>, vector<256x128xf32> -> vector<256x128xf32>
    %8 = arith.addf %3, %7 : vector<256x128xf32>
    %c0_10 = arith.constant 0 : index
    %c0_11 = arith.constant 0 : index
    %9 = vector.load %arg6[%c0_10, %c0_11] : memref<1x128xf32, #tpu.memory_space<vmem>>, vector<1x128xf32>
    %10 = vector.broadcast %9 : vector<1x128xf32> to vector<256x128xf32>
    %11 = arith.addf %8, %10 : vector<256x128xf32>
    %cst_12 = arith.constant 0.000000e+00 : f32
    %12 = vector.broadcast %cst_12 : f32 to vector<256x128xf32>
    %13 = arith.maximumf %11, %12 : vector<256x128xf32>
    %14 = arith.truncf %13 : vector<256x128xf32> to vector<256x128xbf16>
    %c0_13 = arith.constant 0 : index
    %c0_14 = arith.constant 0 : index
    %c0_15 = arith.constant 0 : index
    %15 = vector.load %arg7[%c0_13, %c0_14, %c0_15] : memref<1x256x128xbf16, #tpu.memory_space<vmem>>, vector<1x256x128xbf16>
    %16 = vector.shape_cast %15 : vector<1x256x128xbf16> to vector<256x128xbf16>
    %17 = vector.shape_cast %14 : vector<256x128xbf16> to vector<1x256x128xbf16>
    tpu.vector_store %arg7[%c0_13, %c0_14, %c0_15], %17 {strides = array<i32>} : memref<1x256x128xbf16, #tpu.memory_space<vmem>>, vector<1x256x128xbf16>,
    return
  }
  func.func @transform_0(%arg0: i32, %arg1: i32) -> (i32, i32, i32) {
    %c0_i32 = arith.constant 0 : i32
    %c0_i32_0 = arith.constant 0 : i32
    return %arg0, %arg1, %c0_i32 : i32, i32, i32
  }
  func.func @transform_1(%arg0: i32, %arg1: i32) -> (i32, i32) {
    %c0_i32 = arith.constant 0 : i32
    %c0_i32_0 = arith.constant 0 : i32
    return %arg1, %c0_i32 : i32, i32
  }
  func.func @transform_2(%arg0: i32, %arg1: i32) -> (i32, i32, i32) {
    %c0_i32 = arith.constant 0 : i32
    %c0_i32_0 = arith.constant 0 : i32
    %c0_i32_1 = arith.constant 0 : i32
    return %arg0, %c0_i32, %c0_i32_0 : i32, i32, i32
  }
  func.func @transform_3(%arg0: i32, %arg1: i32) -> (i32, i32) {
    %c0_i32 = arith.constant 0 : i32
    %c0_i32_0 = arith.constant 0 : i32
    %c0_i32_1 = arith.constant 0 : i32
    return %c0_i32, %c0_i32_0 : i32, i32
  }
  func.func @transform_4(%arg0: i32, %arg1: i32) -> (i32, i32) {
    %c0_i32 = arith.constant 0 : i32
    %c0_i32_0 = arith.constant 0 : i32
    %c0_i32_1 = arith.constant 0 : i32
    return %c0_i32, %c0_i32_0 : i32, i32
  }
  func.func @transform_5(%arg0: i32, %arg1: i32) -> (i32, i32, i32) {
    %c0_i32 = arith.constant 0 : i32
    %c0_i32_0 = arith.constant 0 : i32
    return %arg0, %arg1, %c0_i32 : i32, i32, i32
  }
}

module attributes {stable_mosaic.version = 11 : i64} {
  func.func @_psp_bottleneck_kernel(%arg0: i32, %arg1: i32, %arg2: memref<1x256x4xbf16, #tpu.memory_space<vmem>>, %arg3: memref<256x128xbf16, #tpu.memory_space<vmem>>, %arg4: memref<1x128x128xbf16, #tpu.memory_space<vmem>>, %arg5: memref<4x128xbf16, #tpu.memory_space<vmem>>, %arg6: memref<1x128xf32, #tpu.memory_space<vmem>>, %arg7: memref<1x256x128xbf16, #tpu.memory_space<vmem>>) attributes {dimension_semantics = [#tpu.dimension_semantics<parallel>, #tpu.dimension_semantics<parallel>], iteration_bounds = array<i64: 2, 1>, scalar_prefetch = 0 : i64, scratch_operands = 0 : i64, tpu.core_type = #tpu.core_type<tc>, window_params = [{transform_indices = @transform_0, window_bounds = array<i64: 1, 256, 4>}, {transform_indices = @transform_1, window_bounds = array<i64: 256, 128>}, {transform_indices = @transform_2, window_bounds = array<i64: 1, 128, 128>}, {pipeline_mode = #tpu.pipeline_mode<synchronous>, transform_indices = @transform_3, window_bounds = array<i64: 4, 128>}, {pipeline_mode = #tpu.pipeline_mode<synchronous>, transform_indices = @transform_4, window_bounds = array<i64: 1, 128>}, {transform_indices = @transform_5, window_bounds = array<i64: 1, 256, 128>}]} {
    %c0 = arith.constant 0 : index
    %c0_0 = arith.constant 0 : index
    %c0_1 = arith.constant 0 : index
    %0 = vector.load %arg2[%c0, %c0_0, %c0_1] : memref<1x256x4xbf16, #tpu.memory_space<vmem>>, vector<1x256x4xbf16>
    %1 = vector.shape_cast %0 : vector<1x256x4xbf16> to vector<256x4xbf16>
    %c0_2 = arith.constant 0 : index
    %c0_3 = arith.constant 0 : index
    %2 = vector.load %arg5[%c0_2, %c0_3] : memref<4x128xbf16, #tpu.memory_space<vmem>>, vector<4x128xbf16>
    %cst = arith.constant dense<0.000000e+00> : vector<256x128xf32>
    %3 = tpu.matmul %1, %2, %cst {dimension_numbers = #tpu.dot_dimension_numbers<[1], [0], [0], [1], [0, 0, 1, 1], [], []>} : vector<256x4xbf16>, vector<4x128xbf16>, vector<256x128xf32> -> vector<256x128xf32>
    %c0_4 = arith.constant 0 : index
    %c0_5 = arith.constant 0 : index
    %4 = vector.load %arg3[%c0_4, %c0_5] : memref<256x128xbf16, #tpu.memory_space<vmem>>, vector<256x128xbf16>
    %c0_6 = arith.constant 0 : index
    %c0_7 = arith.constant 0 : index
    %c0_8 = arith.constant 0 : index
    %5 = vector.load %arg4[%c0_6, %c0_7, %c0_8] : memref<1x128x128xbf16, #tpu.memory_space<vmem>>, vector<1x128x128xbf16>
    %6 = vector.shape_cast %5 : vector<1x128x128xbf16> to vector<128x128xbf16>
    %cst_9 = arith.constant dense<0.000000e+00> : vector<256x128xf32>
    %7 = tpu.matmul %4, %6, %cst_9 {dimension_numbers = #tpu.dot_dimension_numbers<[1], [0], [0], [1], [0, 0, 1, 1], [], []>} : vector<256x128xbf16>, vector<128x128xbf16>, vector<256x128xf32> -> vector<256x128xf32>
    %8 = arith.addf %3, %7 : vector<256x128xf32>
    %c0_10 = arith.constant 0 : index
    %c0_11 = arith.constant 0 : index
    %9 = vector.load %arg6[%c0_10, %c0_11] : memref<1x128xf32, #tpu.memory_space<vmem>>, vector<1x128xf32>
    %10 = vector.broadcast %9 : vector<1x128xf32> to vector<256x128xf32>
    %11 = arith.addf %8, %10 : vector<256x128xf32>
    %cst_12 = arith.constant 0.000000e+00 : f32
    %12 = vector.broadcast %cst_12 : f32 to vector<256x128xf32>
    %13 = arith.maximumf %11, %12 : vector<256x128xf32>
    %14 = arith.truncf %13 : vector<256x128xf32> to vector<256x128xbf16>
    %c0_13 = arith.constant 0 : index
    %c0_14 = arith.constant 0 : index
    %c0_15 = arith.constant 0 : index
    %15 = vector.load %arg7[%c0_13, %c0_14, %c0_15] : memref<1x256x128xbf16, #tpu.memory_space<vmem>>, vector<1x256x128xbf16>
    %16 = vector.shape_cast %15 : vector<1x256x128xbf16> to vector<256x128xbf16>
    %17 = vector.shape_cast %14 : vector<256x128xbf16> to vector<1x256x128xbf16>
    tpu.vector_store %arg7[%c0_13, %c0_14, %c0_15], %17 {strides = array<i32>} : memref<1x256x128xbf16, #tpu.memory_space<vmem>>, vector<1x256x128xbf16>,
    return
  }
  func.func @transform_0(%arg0: i32, %arg1: i32) -> (i32, i32, i32) {
    %c0_i32 = arith.constant 0 : i32
    %c0_i32_0 = arith.constant 0 : i32
    return %arg0, %arg1, %c0_i32 : i32, i32, i32
  }
  func.func @transform_1(%arg0: i32, %arg1: i32) -> (i32, i32) {
    %c0_i32 = arith.constant 0 : i32
    %c0_i32_0 = arith.constant 0 : i32
    return %arg1, %c0_i32 : i32, i32
  }
  func.func @transform_2(%arg0: i32, %arg1: i32) -> (i32, i32, i32) {
    %c0_i32 = arith.constant 0 : i32
    %c0_i32_0 = arith.constant 0 : i32
    %c0_i32_1 = arith.constant 0 : i32
    return %arg0, %c0_i32, %c0_i32_0 : i32, i32, i32
  }
  func.func @transform_3(%arg0: i32, %arg1: i32) -> (i32, i32) {
    %c0_i32 = arith.constant 0 : i32
    %c0_i32_0 = arith.constant 0 : i32
    %c0_i32_1 = arith.constant 0 : i32
    return %c0_i32, %c0_i32_0 : i32, i32
  }
  func.func @transform_4(%arg0: i32, %arg1: i32) -> (i32, i32) {
    %c0_i32 = arith.constant 0 : i32
    %c0_i32_0 = arith.constant 0 : i32
    %c0_i32_1 = arith.constant 0 : i32
    return %c0_i32, %c0_i32_0 : i32, i32
  }
  func.func @transform_5(%arg0: i32, %arg1: i32) -> (i32, i32, i32) {
    %c0_i32 = arith.constant 0 : i32
    %c0_i32_0 = arith.constant 0 : i32
    return %arg0, %arg1, %c0_i32 : i32, i32, i32
  }
}

</mosaic_0001>

<bundles_post_ra>
// kernel: tpu_custom_call.1
= control target key start
LH: loop header
LB: loop body
LE: loop exit
PB: predicated region body
PF: predicated region fallthrough
CT: control target
= control target key end

     0   :  { %10 = vsyncpa [#allocation3], 0  ;;  %s2255_s0 = inlined_call_operand.vmem [shape: bf16[2,256,4], index: 0, kind: input, shape index: {}]   ;;  %s2256_s1 = inlined_call_operand.vmem [shape: bf16[256,128], index: 1, kind: input, shape index: {}]   ;;  %s2257_s2 = inlined_call_operand.vmem [shape: bf16[2,128,128], index: 2, kind: input, shape index: {}]   ;;  %s2258_s3 = inlined_call_operand.vmem [shape: bf16[4,128], index: 3, kind: input, shape index: {}]   ;;  %s2259_s4 = inlined_call_operand.vmem [shape: f32[1,128], index: 4, kind: input, shape index: {}]   ;;  %s2260_s5 = inlined_call_operand.hbm [shape: bf16[2,256,128], index: 5, kind: output, shape index: {}]  }
   0x1   :  { %12 = vsyncpa [#allocation3 + $0x1], 0  ;;  %s1931_s18 = smov 0   ;;  %s1933_s19 = smov 0  }
   0x2   :  { %s1935_s20 = smov 0   ;;  %s1937_s21 = smov 0  }
   0x3   :  { %s1939_s22 = smov 0   ;;  %s1941_s23 = smov 0  }
   0x4 LB: > { %s1330_s24 = sadd.s32 4294967295, %s1896_s23   ;;  %s1331_s25 = sadd.s32 4294967294, %s1896_s23   ;;  %s1896_s23 = sphi %s1941_s23, %s18_s23   ;;  %s1892_s22 = sphi %s1939_s22, %s2267_s22   ;;  %s1888_s21 = sphi %s1937_s21, %s2266_s21   ;;  %s1884_s20 = sphi %s1935_s20, %s2265_s20   ;;  %s1880_s19 = sphi %s1933_s19, %s2264_s19   ;;  %s1876_s18 = sphi %s1931_s18, %s2263_s18  }
   0x5   : > { %s30_s26 = sadd.s32 1, %s1892_s22  ;;  %s161_s27 = sadd.s32 1, %s1884_s20 }
   0x6   : > { %p32_p0 = scmp.ge.s32.totalorder %s30_s26, 2  ;;  %p171_p1 = scmp.ne.s32.totalorder %s1884_s20, %s1880_s19 }
   0x7   : > { %p172_p2 = scmp.eq.s32.totalorder %s1330_s24, 1  ;;  %p177_p3 = scmp.ne.s32.totalorder %s1880_s19, %s1876_s18 }
   0x8   : > { %s2269_s26 = smov (%p32_p0, %s30_s26), 0  ;;  %p178_p5 = scmp.eq.s32.totalorder %s1331_s25, 1 }
   0x9   : > { %p1971_p4 = por %p172_p2, %p171_p1  ;;  %s156_s29 = ssub.s32 %s1892_s22, %s2269_s26 }
   0xa   : > { %p1335_p6 = scmp.ge.s32.totalorder %s1896_s23, 1  ;;  %p159_p7 = scmp.eq.s32.totalorder %s156_s29, 0 }
   0xb   : > { %p1978_p8 = por %p178_p5, %p177_p3  ;;  %p232_p9 = scmp.lt.s32.totalorder %s1896_s23, 3 }
   0xc   : > { %s1984_s6 = scalar_select %p159_p7, %s1884_s20, %s161_s27  }
   0xd   : > { %p233_p10 = pnand %p1335_p6, %p232_p9 }
   0xe   : > { %p275_p11 = scmp.lt.s32.totalorder (!%p233_p10), %s1888_s21, 1  ;;  %v329_v0 = vld [vmem:[%s2258_s3] sm:$0x3] (!%p233_p10)  ;;  %vm812_vm0 = vcmask (!%p233_p10), 1041408   ;;  %vm763_vm1 = vcmask (!%p233_p10), 31744   ;;  %v1789_v18 = vld [vmem:[%s2256_s1 + $0x8] sm:$0xff] (!%p233_p10)  }
   0xf   : > { %236 = sbr.rel (%p233_p10) target bundleno = 353 (0x161), region = 40  ;;  %v1788_v1 = vld [vmem:[%s2256_s1] sm:$0xff] (!%p233_p10)   ;;  %1720 = vmatprep.subr.msk.bf16.mxu0 (!%p233_p10), %vm812_vm0, %v329_v0  ;;  %v814_v2 = vsel (!%p233_p10), %vm812_vm0, %v329_v0, 0  ;;  %v1792_v19 = vld [vmem:[%s2256_s1 + $0x10] sm:$0xff] (!%p233_p10)   ;;  %v1793_v22 = vld [vmem:[%s2256_s1 + $0x18] sm:$0xff] (!%p233_p10)   ;;  %s271_s8 = sand.u32 (!%p233_p10), 1, %s1880_s19  }
  0x10   : > { %1655 = vmatpush3.bf16.msra.mxu0 (!%p233_p10), %v814_v2  ;;  %1622 = vmatprep.mubr.bf16.mxu1 (!%p233_p10), %v1788_v1  ;;  %v1796_v23 = vld [vmem:[%s2256_s1 + $0x20] sm:$0xff] (!%p233_p10)   ;;  %v1797_v26 = vld [vmem:[%s2256_s1 + $0x28] sm:$0xff] (!%p233_p10)   ;;  %v1800_v27 = vld [vmem:[%s2256_s1 + $0x30] sm:$0xff] (!%p233_p10)   ;;  %s1336_s9 = sshll.u32 (!%p233_p10), %s271_s8, 7  ;;  %s1898_s17 = smov (!%p233_p10), [#allocation2]  }
  0x11   : > { %v1801_v30 = vld [vmem:[%s2256_s1 + $0x38] sm:$0xff] (!%p233_p10)   ;;  %v1804_v31 = vld [vmem:[%s2256_s1 + $0x40] sm:$0xff] (!%p233_p10)   ;;  %v1805_v34 = vld [vmem:[%s2256_s1 + $0x48] sm:$0xff] (!%p233_p10)   ;;  %s2115_s10 = scalar_lea.vmem (!%p233_p10), [#allocation2], %s1336_s9 }
  0x12   : > { %v1808_v35 = vld [vmem:[%s2256_s1 + $0x50] sm:$0xff] (!%p233_p10)   ;;  %v1809_v37 = vld [vmem:[%s2256_s1 + $0x58] sm:$0xff] (!%p233_p10)   ;;  %v1812_v38 = vld [vmem:[%s2256_s1 + $0x60] sm:$0xff] (!%p233_p10)  }
  0x13   : > { %v1813_v39 = vld [vmem:[%s2256_s1 + $0x68] sm:$0xff] (!%p233_p10)   ;;  %v1816_v40 = vld [vmem:[%s2256_s1 + $0x70] sm:$0xff] (!%p233_p10)   ;;  %v1817_v41 = vld [vmem:[%s2256_s1 + $0x78] sm:$0xff] (!%p233_p10)  }
  0x14   : > { %v2094_v55 = vld [vmem:[%s2259_s4] ss:$0 sm:$0xff] (!%p233_p10) }
  0x16   : > { %s276_s11 = scalar_select %p275_p11, %s1888_s21, 1 }
  0x18   : > { %s1436_s12 = sshll.u32 %s276_s11, 6  ;;  %s1435_s16 = sshll.u32 %s276_s11, 7 }
  0x19   : > { %s1997_s15 = scalar_lea.vmem %s2257_s2, %s1436_s12  ;;  %s2005_s25 = scalar_lea.vmem %s2255_s0, %s1435_s16 }
  0x1a   : > { %v1778_v3 = vld [vmem:[%s1997_s15] sm:$0xff]   ;;  %v1779_v4 = vld [vmem:[%s1997_s15 + $0x8] sm:$0xff]   ;;  %v1780_v5 = vld [vmem:[%s1997_s15 + $0x10] sm:$0xff]   ;;  %s1469_s11 = sshll.u32 %s1888_s21, 11  ;;  %s1224_s12 = sshll.u32 %s2115_s10, 4  ;;  %s2203_s12 = int_to_ptr.vmem [resolvable:$true] %s1224_s12 }
  0x1b   : > { %1606 = vmatprep.subr.bf16.mxu1 %v1778_v3  ;;  %v1781_v6 = vld [vmem:[%s1997_s15 + $0x18] sm:$0xff]   ;;  %v1786_v7 = vld [vmem:[%s2005_s25] sm:$0xff]   ;;  %v1787_v8 = vld [vmem:[%s2005_s25 + $0x8] sm:$0xff]   ;;  %s2209_s21 = scalar_lea.sflag [#allocation3], %s271_s8  ;;  %s1818_s16 = scalar_lea.vmem %s2203_s12, 2048 }
  0x1c   : > { %1607 = vmatpush3.bf16.msra.mxu1 %v1778_v3  ;;  %1656 = vmatprep.mubr.msk.bf16.mxu0 %vm763_vm1, %v1786_v7  ;;  %v1790_v9 = vld [vmem:[%s2005_s25 + $0x10] sm:$0xff]   ;;  %v1782_v10 = vld [vmem:[%s1997_s15 + $0x20] sm:$0xff]   ;;  %v1783_v11 = vld [vmem:[%s1997_s15 + $0x28] sm:$0xff]   ;;  %p1819_p12 = scmp.ne.s32.totalorder %s2203_s12, %s1818_s16 }
  0x1d   : > { %1608 = vmatprep.subr.bf16.mxu1 %v1779_v4  ;;  %1657 = vmatmul.mubr.msk.bf16.vlgmr.msra.gmra.mrb[0].mxu0 %vm763_vm1, %v1787_v8  ;;  %v1791_v12 = vld [vmem:[%s2005_s25 + $0x18] sm:$0xff]   ;;  %v1794_v13 = vld [vmem:[%s2005_s25 + $0x20] sm:$0xff]   ;;  %v1784_v14 = vld [vmem:[%s1997_s15 + $0x30] sm:$0xff]  }
  0x1e   : > { %1660 = vmatprep.mubr.msk.bf16.mxu0 %vm763_vm1, %v1790_v9  ;;  %v1785_v15 = vld [vmem:[%s1997_s15 + $0x38] sm:$0xff]   ;;  %v1795_v16 = vld [vmem:[%s2005_s25 + $0x28] sm:$0xff]   ;;  %v1798_v17 = vld [vmem:[%s2005_s25 + $0x30] sm:$0xff]   ;;  %s2201_s15 = scalar_lea.hbm %s2260_s5, %s1469_s11  ;;  %p1820_p13 = pnand %p1819_p12, %p1971_p4 }
  0x1f   : > { %v1799_v20 = vld [vmem:[%s2005_s25 + $0x38] sm:$0xff]   ;;  %v1802_v21 = vld [vmem:[%s2005_s25 + $0x40] sm:$0xff]   ;;  %v1803_v24 = vld [vmem:[%s2005_s25 + $0x48] sm:$0xff]  }
  0x20   : > { %1609 = vmatpush3.bf16.msra.mxu1 %v1779_v4  ;;  %v1806_v25 = vld [vmem:[%s2005_s25 + $0x50] sm:$0xff]   ;;  %v1807_v28 = vld [vmem:[%s2005_s25 + $0x58] sm:$0xff]   ;;  %v1810_v29 = vld [vmem:[%s2005_s25 + $0x60] sm:$0xff]   ;;  %p1821_p0 = pneg %p1820_p13 }
  0x21   : > { %1610 = vmatprep.subr.bf16.mxu1 %v1780_v5  ;;  %v1811_v32 = vld [vmem:[%s2005_s25 + $0x68] sm:$0xff]   ;;  %v1814_v33 = vld [vmem:[%s2005_s25 + $0x70] sm:$0xff]   ;;  %v1815_v36 = vld [vmem:[%s2005_s25 + $0x78] sm:$0xff]   ;;  %s1822_s25 = sshll.u32 %s1898_s17, 4  ;;  %s1823_s25 = int_to_ptr.vmem [resolvable:$false] %s1822_s25 }
  0x22   : > { %s1824_s24 = scalar_lea.vmem %s1823_s25, 4096  ;;  %p1825_p1 = scmp.lt.s32.totalorder %s2203_s12, %s1823_s25 }
  0x23   : > { %p1826_p2 = scmp.lt.s32.totalorder %s1824_s24, %s1818_s16 }
  0x24   : > { %1611 = vmatpush3.bf16.msra.mxu1 %v1780_v5 }
  0x25   : > { %1612 = vmatprep.subr.bf16.mxu1 %v1781_v6  ;;  %1661 = vmatmul.mubr.msk.bf16.gmra.mrb[4].mxu0 %vm763_vm1, %v1791_v12  ;;  %p1827_p3 = por %p1826_p2, %p1825_p1 }
  0x26   : > { %1664 = vmatprep.mubr.msk.bf16.mxu0 %vm763_vm1, %v1794_v13 }
  0x27   : > { %p1828_p5 = pnand %p1827_p3, %p1821_p0 }
  0x28   : > { %1613 = vmatpush3.bf16.msra.mxu1 %v1781_v6 }
  0x29   : > { %1614 = vmatprep.subr.bf16.mxu1 %v1782_v10 }
  0x2c   : > { %1615 = vmatpush3.bf16.msra.mxu1 %v1782_v10 }
  0x2d   : > { %1616 = vmatprep.subr.bf16.mxu1 %v1783_v11  ;;  %1665 = vmatmul.mubr.msk.bf16.gmra.mrb[8].mxu0 %vm763_vm1, %v1795_v16 }
  0x2e   : > { %1668 = vmatprep.mubr.msk.bf16.mxu0 %vm763_vm1, %v1798_v17 }
  0x30   : > { %1617 = vmatpush3.bf16.msra.mxu1 %v1783_v11 }
  0x31   : > { %1618 = vmatprep.subr.bf16.mxu1 %v1784_v14 }
  0x34   : > { %1619 = vmatpush3.bf16.msra.mxu1 %v1784_v14 }
  0x35   : > { %1620 = vmatprep.subr.bf16.mxu1 %v1785_v15  ;;  %1669 = vmatmul.mubr.msk.bf16.gmra.mrb[12].mxu0 %vm763_vm1, %v1799_v20 }
  0x36   : > { %1672 = vmatprep.mubr.msk.bf16.mxu0 %vm763_vm1, %v1802_v21 }
  0x38   : > { %1621 = vmatpush3.bf16.msra.mxu1 %v1785_v15 }
  0x3b   : > { %1623 = vmatmul.mubr.bf16.vlgmr.msra.gmra.mrb[0].mxu1 %v1789_v18 }
  0x3c   : > { %1626 = vmatprep.mubr.bf16.mxu1 %v1792_v19 }
  0x3d   : > { %1673 = vmatmul.mubr.msk.bf16.gmra.mrb[16].mxu0 %vm763_vm1, %v1803_v24 }
  0x3e   : > { %1676 = vmatprep.mubr.msk.bf16.mxu0 %vm763_vm1, %v1806_v25 }
  0x43   : > { %1627 = vmatmul.mubr.bf16.gmra.mrb[4].mxu1 %v1793_v22 }
  0x44   : > { %1630 = vmatprep.mubr.bf16.mxu1 %v1796_v23 }
  0x45   : > { %1677 = vmatmul.mubr.msk.bf16.gmra.mrb[20].mxu0 %vm763_vm1, %v1807_v28 }
  0x46   : > { %1680 = vmatprep.mubr.msk.bf16.mxu0 %vm763_vm1, %v1810_v29 }
  0x4b   : > { %1631 = vmatmul.mubr.bf16.gmra.mrb[8].mxu1 %v1797_v26 }
  0x4c   : > { %1634 = vmatprep.mubr.bf16.mxu1 %v1800_v27 }
  0x4d   : > { %1681 = vmatmul.mubr.msk.bf16.gmra.mrb[24].mxu0 %vm763_vm1, %v1811_v32 }
  0x4e   : > { %1684 = vmatprep.mubr.msk.bf16.mxu0 %vm763_vm1, %v1814_v33 }
  0x53   : > { %1635 = vmatmul.mubr.bf16.gmra.mrb[12].mxu1 %v1801_v30 }
  0x54   : > { %1638 = vmatprep.mubr.bf16.mxu1 %v1804_v31 }
  0x55   : > { %1685 = vmatmul.mubr.msk.bf16.gmra.mrb[28].mxu0 %vm763_vm1, %v1815_v36 }
  0x5b   : > { %1639 = vmatmul.mubr.bf16.gmra.mrb[16].mxu1 %v1805_v34 }
  0x5c   : > { %1642 = vmatprep.mubr.bf16.mxu1 %v1808_v35 }
  0x63   : > { %1643 = vmatmul.mubr.bf16.gmra.mrb[20].mxu1 %v1809_v37 }
  0x64   : > { %1646 = vmatprep.mubr.bf16.mxu1 %v1812_v38 }
  0x6b   : > { %1647 = vmatmul.mubr.bf16.gmra.mrb[24].mxu1 %v1813_v39 }
  0x6c   : > { %1650 = vmatprep.mubr.bf16.mxu1 %v1816_v40 }
  0x73   : > { %1651 = vmatmul.mubr.bf16.gmra.mrb[28].mxu1 %v1817_v41 }
  0xf0   : > { %v1658_v42 = vpop.f32.mrb[0].mxu0 }
  0xf1   : > { %v850_v43 = vpop.f32.mrb[1].mxu0 }
  0xf2   : > { %v1659_v44 = vpop.f32.mrb[2].mxu0 }
  0xf3   : > { %v853_v45 = vpop.f32.mrb[3].mxu0 }
  0xf8   : > { %v1662_v46 = vpop.f32.mrb[4].mxu0 }
  0xf9   : > { %v866_v47 = vpop.f32.mrb[5].mxu0 }
  0xfa   : > { %v1663_v48 = vpop.f32.mrb[6].mxu0 }
  0xfb   : > { %v869_v49 = vpop.f32.mrb[7].mxu0 }
 0x100   : > { %v1666_v50 = vpop.f32.mrb[8].mxu0 }
 0x101   : > { %v882_v51 = vpop.f32.mrb[9].mxu0 }
 0x102   : > { %v1667_v52 = vpop.f32.mrb[10].mxu0 }
 0x103   : > { %v2089_v53 = vpop.f32.mrb[11].mxu0 }
 0x108   : > { %v2096_v58 = vpop.f32.mrb[12].mxu0 }
 0x109   : > { %v2099_v61 = vpop.f32.mrb[13].mxu0 }
 0x10a   : > { %v2102_v1 = vpop.f32.mrb[14].mxu0 }
 0x10b   : > { %v2105_v4 = vpop.f32.mrb[15].mxu0 }
 0x10e   : > { %v1624_v54 = vpop.f32.mrb[0].mxu1 }
 0x10f   : > { %v859_v56 = vadd.f32 %v1658_v42, %v1624_v54  ;;  %v556_v57 = vpop.f32.mrb[1].mxu1 }
 0x110   : > { %v851_v59 = vadd.f32 %v850_v43, %v556_v57  ;;  %v1625_v60 = vpop.f32.mrb[2].mxu1  ;;  %v2111_v15 = vpop.f32.mrb[16].mxu0 }
 0x111   : > { %v986_v62 = vadd.f32 %v2094_v55, %v859_v56  ;;  %v862_v63 = vadd.f32 %v1659_v44, %v1625_v60  ;;  %v559_v0 = vpop.f32.mrb[3].mxu1  ;;  %v2113_v19 = vpop.f32.mrb[17].mxu0 }
 0x112   : > { %v984_v2 = vadd.f32 %v2094_v55, %v851_v59  ;;  %v854_v3 = vadd.f32 %v853_v45, %v559_v0  ;;  %v2119_v23 = vpop.f32.mrb[18].mxu0 }
 0x113   : > { %v987_v5 = vadd.f32 %v2094_v55, %v862_v63  ;;  %v1018_v7 = vmax.f32 %v986_v62, 0.0  ;;  %v2123_v26 = vpop.f32.mrb[19].mxu0 }
 0x114   : > { %v985_v6 = vadd.f32 %v2094_v55, %v854_v3  ;;  %v1016_v9 = vmax.f32 %v984_v2, 0.0 }
 0x115   : > { %v1019_v8 = vmax.f32 %v987_v5, 0.0 }
 0x116   : > { %v1017_v10 = vmax.f32 %v985_v6, 0.0  ;;  %v1628_v11 = vpop.f32.mrb[4].mxu1 }
 0x117   : > { %v1478_v12 = vpack.c.bf16 %v1019_v8, %v1018_v7  ;;  %v875_v13 = vadd.f32 %v1662_v46, %v1628_v11  ;;  %v572_v14 = vpop.f32.mrb[5].mxu1 }
 0x118   : > { %v1473_v16 = vpack.c.bf16 %v1017_v10, %v1016_v9  ;;  %v867_v17 = vadd.f32 %v866_v47, %v572_v14  ;;  %v1629_v18 = vpop.f32.mrb[6].mxu1  ;;  %v2127_v37 = vpop.f32.mrb[20].mxu0 }
 0x119   : > { %1550 = vst [vmem:[%s2115_s10 + $0x8] sm:$0xff] %v1478_v12   ;;  %v990_v20 = vadd.f32 %v2094_v55, %v875_v13  ;;  %v878_v21 = vadd.f32 %v1663_v48, %v1629_v18  ;;  %v575_v22 = vpop.f32.mrb[7].mxu1  ;;  %v2129_v41 = vpop.f32.mrb[21].mxu0 }
 0x11a   : > { %1474 = vst [vmem:[%s2115_s10] sm:$0xff] %v1473_v16   ;;  %v988_v24 = vadd.f32 %v2094_v55, %v867_v17  ;;  %v870_v25 = vadd.f32 %v869_v49, %v575_v22  ;;  %v2133_v45 = vpop.f32.mrb[22].mxu0 }
 0x11b   : > { %v991_v27 = vadd.f32 %v2094_v55, %v878_v21  ;;  %v1022_v29 = vmax.f32 %v990_v20, 0.0  ;;  %v2138_v48 = vpop.f32.mrb[23].mxu0 }
 0x11c   : > { %v989_v28 = vadd.f32 %v2094_v55, %v870_v25  ;;  %v1020_v31 = vmax.f32 %v988_v24, 0.0 }
 0x11d   : > { %v1023_v30 = vmax.f32 %v991_v27, 0.0 }
 0x11e   : > { %v1021_v32 = vmax.f32 %v989_v28, 0.0  ;;  %v1632_v33 = vpop.f32.mrb[8].mxu1 }
 0x11f   : > { %v1488_v34 = vpack.c.bf16 %v1023_v30, %v1022_v29  ;;  %v891_v35 = vadd.f32 %v1666_v50, %v1632_v33  ;;  %v588_v36 = vpop.f32.mrb[9].mxu1 }
 0x120   : > { %v1483_v38 = vpack.c.bf16 %v1021_v32, %v1020_v31  ;;  %v883_v39 = vadd.f32 %v882_v51, %v588_v36  ;;  %v1633_v40 = vpop.f32.mrb[10].mxu1  ;;  %v2143_v63 = vpop.f32.mrb[24].mxu0 }
 0x121   : > { %1552 = vst [vmem:[%s2115_s10 + $0x18] sm:$0xff] %v1488_v34   ;;  %v994_v42 = vadd.f32 %v2094_v55, %v891_v35  ;;  %v894_v43 = vadd.f32 %v1667_v52, %v1633_v40  ;;  %v591_v44 = vpop.f32.mrb[11].mxu1  ;;  %v2146_v3 = vpop.f32.mrb[25].mxu0 }
 0x122   : > { %1551 = vst [vmem:[%s2115_s10 + $0x10] sm:$0xff] %v1483_v38   ;;  %v992_v46 = vadd.f32 %v2094_v55, %v883_v39  ;;  %v886_v47 = vadd.f32 %v2089_v53, %v591_v44  ;;  %v2151_v8 = vpop.f32.mrb[26].mxu0 }
 0x123   : > { %v995_v49 = vadd.f32 %v2094_v55, %v894_v43  ;;  %v1026_v51 = vmax.f32 %v994_v42, 0.0  ;;  %v2156_v10 = vpop.f32.mrb[27].mxu0 }
 0x124   : > { %v993_v50 = vadd.f32 %v2094_v55, %v886_v47  ;;  %v1024_v56 = vmax.f32 %v992_v46, 0.0 }
 0x125   : > { %v1027_v54 = vmax.f32 %v995_v49, 0.0 }
 0x126   : > { %v1025_v52 = vmax.f32 %v993_v50, 0.0  ;;  %v1636_v57 = vpop.f32.mrb[12].mxu1 }
 0x127   : > { %v1498_v59 = vpack.c.bf16 %v1027_v54, %v1026_v51  ;;  %v907_v60 = vadd.f32 %v2096_v58, %v1636_v57  ;;  %v604_v62 = vpop.f32.mrb[13].mxu1 }
 0x128   : > { %v1493_v53 = vpack.c.bf16 %v1025_v52, %v1024_v56  ;;  %v899_v0 = vadd.f32 %v2099_v61, %v604_v62  ;;  %v1637_v2 = vpop.f32.mrb[14].mxu1  ;;  %v1686_v21 = vpop.f32.mrb[28].mxu0 }
 0x129   : > { %1554 = vst [vmem:[%s2115_s10 + $0x28] sm:$0xff] %v1498_v59   ;;  %v998_v5 = vadd.f32 %v2094_v55, %v907_v60  ;;  %v910_v6 = vadd.f32 %v2102_v1, %v1637_v2  ;;  %v607_v7 = vpop.f32.mrb[15].mxu1  ;;  %v962_v25 = vpop.f32.mrb[29].mxu0 }
 0x12a   : > { %1553 = vst [vmem:[%s2115_s10 + $0x20] sm:$0xff] %v1493_v53   ;;  %v996_v58 = vadd.f32 %v2094_v55, %v899_v0  ;;  %v902_v9 = vadd.f32 %v2105_v4, %v607_v7  ;;  %v1687_v30 = vpop.f32.mrb[30].mxu0 }
 0x12b   : > { %v999_v61 = vadd.f32 %v2094_v55, %v910_v6  ;;  %v1030_v12 = vmax.f32 %v998_v5, 0.0  ;;  %v965_v32 = vpop.f32.mrb[31].mxu0 }
 0x12c   : > { %v997_v11 = vadd.f32 %v2094_v55, %v902_v9  ;;  %v1028_v14 = vmax.f32 %v996_v58, 0.0 }
 0x12d   : > { %v1031_v13 = vmax.f32 %v999_v61, 0.0 }
 0x12e   : > { %v1029_v1 = vmax.f32 %v997_v11, 0.0  ;;  %v1640_v16 = vpop.f32.mrb[16].mxu1 }
 0x12f   : > { %v1508_v17 = vpack.c.bf16 %v1031_v13, %v1030_v12  ;;  %v923_v18 = vadd.f32 %v2111_v15, %v1640_v16  ;;  %v620_v20 = vpop.f32.mrb[17].mxu1 }
 0x130   : > { %v1503_v22 = vpack.c.bf16 %v1029_v1, %v1028_v14  ;;  %v915_v4 = vadd.f32 %v2113_v19, %v620_v20  ;;  %v1641_v24 = vpop.f32.mrb[18].mxu1 }
 0x131   : > { %1556 = vst [vmem:[%s2115_s10 + $0x38] sm:$0xff] %v1508_v17   ;;  %v1002_v27 = vadd.f32 %v2094_v55, %v923_v18  ;;  %v926_v28 = vadd.f32 %v2119_v23, %v1641_v24  ;;  %v623_v29 = vpop.f32.mrb[19].mxu1 }
 0x132   : > { %1555 = vst [vmem:[%s2115_s10 + $0x30] sm:$0xff] %v1503_v22   ;;  %v1000_v31 = vadd.f32 %v2094_v55, %v915_v4  ;;  %v918_v15 = vadd.f32 %v2123_v26, %v623_v29 }
 0x133   : > { %v1003_v33 = vadd.f32 %v2094_v55, %v926_v28  ;;  %v1034_v34 = vmax.f32 %v1002_v27, 0.0 }
 0x134   : > { %v1001_v19 = vadd.f32 %v2094_v55, %v918_v15  ;;  %v1032_v36 = vmax.f32 %v1000_v31, 0.0 }
 0x135   : > { %v1035_v35 = vmax.f32 %v1003_v33, 0.0 }
 0x136   : > { %v1033_v38 = vmax.f32 %v1001_v19, 0.0  ;;  %v1644_v39 = vpop.f32.mrb[20].mxu1 }
 0x137   : > { %v1518_v23 = vpack.c.bf16 %v1035_v35, %v1034_v34  ;;  %v939_v40 = vadd.f32 %v2127_v37, %v1644_v39  ;;  %v636_v42 = vpop.f32.mrb[21].mxu1 }
 0x138   : > { %v1513_v43 = vpack.c.bf16 %v1033_v38, %v1032_v36  ;;  %v931_v44 = vadd.f32 %v2129_v41, %v636_v42  ;;  %v1645_v46 = vpop.f32.mrb[22].mxu1 }
 0x139   : > { %1558 = vst [vmem:[%s2115_s10 + $0x48] sm:$0xff] %v1518_v23   ;;  %v1006_v26 = vadd.f32 %v2094_v55, %v939_v40  ;;  %v942_v47 = vadd.f32 %v2133_v45, %v1645_v46  ;;  %v639_v49 = vpop.f32.mrb[23].mxu1 }
 0x13a   : > { %1557 = vst [vmem:[%s2115_s10 + $0x40] sm:$0xff] %v1513_v43   ;;  %v1004_v50 = vadd.f32 %v2094_v55, %v931_v44  ;;  %v934_v51 = vadd.f32 %v2138_v48, %v639_v49 }
 0x13b   : > { %v1007_v54 = vadd.f32 %v2094_v55, %v942_v47  ;;  %v1038_v56 = vmax.f32 %v1006_v26, 0.0 }
 0x13c   : > { %v1005_v37 = vadd.f32 %v2094_v55, %v934_v51  ;;  %v1036_v52 = vmax.f32 %v1004_v50, 0.0 }
 0x13d   : > { %v1039_v41 = vmax.f32 %v1007_v54, 0.0 }
 0x13e   : > { %v1037_v57 = vmax.f32 %v1005_v37, 0.0  ;;  %v1648_v59 = vpop.f32.mrb[24].mxu1 }
 0x13f   : > { %v1528_v60 = vpack.c.bf16 %v1039_v41, %v1038_v56  ;;  %v955_v45 = vadd.f32 %v2143_v63, %v1648_v59  ;;  %v652_v62 = vpop.f32.mrb[25].mxu1 }
 0x140   : > { %v1523_v53 = vpack.c.bf16 %v1037_v57, %v1036_v52  ;;  %v947_v0 = vadd.f32 %v2146_v3, %v652_v62  ;;  %v1649_v2 = vpop.f32.mrb[26].mxu1 }
 0x141   : > { %1560 = vst [vmem:[%s2115_s10 + $0x58] sm:$0xff] %v1528_v60   ;;  %v1010_v48 = vadd.f32 %v2094_v55, %v955_v45  ;;  %v958_v5 = vadd.f32 %v2151_v8, %v1649_v2  ;;  %v655_v6 = vpop.f32.mrb[27].mxu1 }
 0x142   : > { %1559 = vst [vmem:[%s2115_s10 + $0x50] sm:$0xff] %v1523_v53   ;;  %v1008_v7 = vadd.f32 %v2094_v55, %v947_v0  ;;  %v950_v58 = vadd.f32 %v2156_v10, %v655_v6 }
 0x143   : > { %v1011_v9 = vadd.f32 %v2094_v55, %v958_v5  ;;  %v1042_v61 = vmax.f32 %v1010_v48, 0.0 }
 0x144   : > { %v1009_v63 = vadd.f32 %v2094_v55, %v950_v58  ;;  %v1040_v11 = vmax.f32 %v1008_v7, 0.0 }
 0x145   : > { %v1043_v3 = vmax.f32 %v1011_v9, 0.0 }
 0x146   : > { %v1041_v12 = vmax.f32 %v1009_v63, 0.0  ;;  %v1652_v13 = vpop.f32.mrb[28].mxu1 }
 0x147   : > { %v1538_v14 = vpack.c.bf16 %v1043_v3, %v1042_v61  ;;  %v971_v8 = vadd.f32 %v1686_v21, %v1652_v13  ;;  %v668_v1 = vpop.f32.mrb[29].mxu1 }
 0x148   : > { %v1533_v16 = vpack.c.bf16 %v1041_v12, %v1040_v11  ;;  %v963_v17 = vadd.f32 %v962_v25, %v668_v1  ;;  %v1653_v18 = vpop.f32.mrb[30].mxu1 }
 0x149   : > { %1562 = vst [vmem:[%s2115_s10 + $0x68] sm:$0xff] %v1538_v14   ;;  %v1014_v10 = vadd.f32 %v2094_v55, %v971_v8  ;;  %v974_v20 = vadd.f32 %v1687_v30, %v1653_v18  ;;  %v671_v22 = vpop.f32.mrb[31].mxu1 }
 0x14a   : > { %1561 = vst [vmem:[%s2115_s10 + $0x60] sm:$0xff] %v1533_v16   ;;  %v1012_v4 = vadd.f32 %v2094_v55, %v963_v17  ;;  %v966_v24 = vadd.f32 %v965_v32, %v671_v22 }
 0x14b   : > { %v1015_v27 = vadd.f32 %v2094_v55, %v974_v20  ;;  %v1046_v25 = vmax.f32 %v1014_v10, 0.0 }
 0x14c   : > { %v1013_v21 = vadd.f32 %v2094_v55, %v966_v24  ;;  %v1044_v29 = vmax.f32 %v1012_v4, 0.0 }
 0x14d   : > { %v1047_v28 = vmax.f32 %v1015_v27, 0.0 }
 0x14e   : > { %v1045_v31 = vmax.f32 %v1013_v21, 0.0 }
 0x14f   : > { %v1548_v30 = vpack.c.bf16 %v1047_v28, %v1046_v25 }
 0x150   : > { %v1543_v15 = vpack.c.bf16 %v1045_v31, %v1044_v29 }
 0x151   : > { %1564 = vst [vmem:[%s2115_s10 + $0x78] sm:$0xff] %v1548_v30  }
 0x152   : > { %1563 = vst [vmem:[%s2115_s10 + $0x70] sm:$0xff] %v1543_v15  }
 0x153   : > { %1831 = shalt.err (!%p1828_p5)
}
 0x154   : > { %s1832_s27 = scalar_lea.hbm %s2201_s15, 2048  ;;  %s1836_s8 = scalar_lea.hbm %s2260_s5, 4096 }
 0x155   : > { %p1833_p6 = scmp.ne.s32.totalorder %s2201_s15, %s1832_s27  ;;  %p1837_p10 = scmp.lt.u32.totalorder %s2201_s15, %s2260_s5 }
 0x156   : > { %p1838_p11 = scmp.lt.u32.totalorder %s1836_s8, %s1832_s27  ;;  %p1840_p13 = scmp.lt.u32.totalorder %s1832_s27, %s2201_s15 }
 0x157   : > { %p1834_p7 = pnand %p1833_p6, %p1971_p4 }
 0x158   : > { %p1839_p12 = por %p1838_p11, %p1837_p10 }
 0x159   : > { %p1835_p9 = pneg %p1834_p7 }
 0x15a   : > { %p1841_p0 = por %p1840_p13, %p1839_p12 }
 0x15c   : > { %p1842_p1 = pnand %p1841_p0, %p1835_p9 }
 0x15e   : > { %1845 = shalt.err (!%p1842_p1)
}
 0x15f   : > { %s1899_s11 = smov 64   ;;  %s1900_s13 = smov 4  }
 0x160   : > { %1721 = dma.vmem_to_hbm [thread:$0]  (%p1971_p4), %s2203_s12, 2048, %s2201_s15, %s2209_s21, %s1899_s11, %s1899_s11, %s1900_s13  }
 0x161 PF: > { %p1727_p2 = scmp.ge.s32.totalorder %s1896_s23, 2  ;;  %s1239_s14 = sand.u32 1, %s1876_s18  }
 0x162   : > { %s1240_s16 = scalar_lea.sflag [#allocation3], %s1239_s14 }
 0x163   : > { %p1724_p3 = pnand %p1727_p2, %p1978_p8 }
 0x165   : > { %1871 = dma.done.wait (!%p1724_p3), %s1240_s16, 2048  }
 0x166   : > { %1873 = vsyncadd (!%p1724_p3), %s1240_s16, 4294965248  ;;  %s18_s23 = sadd.s32 1, %s1896_s23   ;;  %s2263_s18 = smov %s1880_s19 }
 0x167   : > { %p15_p5 = scmp.ge.s32.totalorder %s18_s23, 4   ;;  %s2264_s19 = smov %s1884_s20 }
 0x168   : > { %s2265_s20 = smov %s1984_s6  ;;  %s2266_s21 = smov %s1892_s22 }
 0x169   : > { %s2267_s22 = smov %s2269_s26  ;;  %17 = sbr.rel (!%p15_p5) target bundleno = 4 (0x4), region = 81 }
 0x170   :  { %1245 = vsyncpa [#allocation3], 1 }
 0x171   :  { %1247 = vsyncpa [#allocation3 + $0x1], 1 }

// kernel: tpu_custom_call.1
= control target key start
LH: loop header
LB: loop body
LE: loop exit
PB: predicated region body
PF: predicated region fallthrough
CT: control target
= control target key end

     0   :  { %10 = vsyncpa [#allocation3], 0  ;;  %s2255_s0 = inlined_call_operand.vmem [shape: bf16[2,256,4], index: 0, kind: input, shape index: {}]   ;;  %s2256_s1 = inlined_call_operand.vmem [shape: bf16[256,128], index: 1, kind: input, shape index: {}]   ;;  %s2257_s2 = inlined_call_operand.vmem [shape: bf16[2,128,128], index: 2, kind: input, shape index: {}]   ;;  %s2258_s3 = inlined_call_operand.vmem [shape: bf16[4,128], index: 3, kind: input, shape index: {}]   ;;  %s2259_s4 = inlined_call_operand.vmem [shape: f32[1,128], index: 4, kind: input, shape index: {}]   ;;  %s2260_s5 = inlined_call_operand.hbm [shape: bf16[2,256,128], index: 5, kind: output, shape index: {}]  }
   0x1   :  { %12 = vsyncpa [#allocation3 + $0x1], 0  ;;  %s1931_s18 = smov 0   ;;  %s1933_s19 = smov 0  }
   0x2   :  { %s1935_s20 = smov 0   ;;  %s1937_s21 = smov 0  }
   0x3   :  { %s1939_s22 = smov 0   ;;  %s1941_s23 = smov 0  }
   0x4 LB: > { %s1330_s24 = sadd.s32 4294967295, %s1896_s23   ;;  %s1331_s25 = sadd.s32 4294967294, %s1896_s23   ;;  %s1896_s23 = sphi %s1941_s23, %s18_s23   ;;  %s1892_s22 = sphi %s1939_s22, %s2267_s22   ;;  %s1888_s21 = sphi %s1937_s21, %s2266_s21   ;;  %s1884_s20 = sphi %s1935_s20, %s2265_s20   ;;  %s1880_s19 = sphi %s1933_s19, %s2264_s19   ;;  %s1876_s18 = sphi %s1931_s18, %s2263_s18  }
   0x5   : > { %s30_s26 = sadd.s32 1, %s1892_s22  ;;  %s161_s27 = sadd.s32 1, %s1884_s20 }
   0x6   : > { %p32_p0 = scmp.ge.s32.totalorder %s30_s26, 2  ;;  %p171_p1 = scmp.ne.s32.totalorder %s1884_s20, %s1880_s19 }
   0x7   : > { %p172_p2 = scmp.eq.s32.totalorder %s1330_s24, 1  ;;  %p177_p3 = scmp.ne.s32.totalorder %s1880_s19, %s1876_s18 }
   0x8   : > { %s2269_s26 = smov (%p32_p0, %s30_s26), 0  ;;  %p178_p5 = scmp.eq.s32.totalorder %s1331_s25, 1 }
   0x9   : > { %p1971_p4 = por %p172_p2, %p171_p1  ;;  %s156_s29 = ssub.s32 %s1892_s22, %s2269_s26 }
   0xa   : > { %p1335_p6 = scmp.ge.s32.totalorder %s1896_s23, 1  ;;  %p159_p7 = scmp.eq.s32.totalorder %s156_s29, 0 }
   0xb   : > { %p1978_p8 = por %p178_p5, %p177_p3  ;;  %p232_p9 = scmp.lt.s32.totalorder %s1896_s23, 3 }
   0xc   : > { %s1984_s6 = scalar_select %p159_p7, %s1884_s20, %s161_s27  }
   0xd   : > { %p233_p10 = pnand %p1335_p6, %p232_p9 }
   0xe   : > { %p275_p11 = scmp.lt.s32.totalorder (!%p233_p10), %s1888_s21, 1  ;;  %v329_v0 = vld [vmem:[%s2258_s3] sm:$0x3] (!%p233_p10)  ;;  %vm812_vm0 = vcmask (!%p233_p10), 1041408   ;;  %vm763_vm1 = vcmask (!%p233_p10), 31744   ;;  %v1789_v18 = vld [vmem:[%s2256_s1 + $0x8] sm:$0xff] (!%p233_p10)  }
   0xf   : > { %236 = sbr.rel (%p233_p10) target bundleno = 353 (0x161), region = 40  ;;  %v1788_v1 = vld [vmem:[%s2256_s1] sm:$0xff] (!%p233_p10)   ;;  %1720 = vmatprep.subr.msk.bf16.mxu0 (!%p233_p10), %vm812_vm0, %v329_v0  ;;  %v814_v2 = vsel (!%p233_p10), %vm812_vm0, %v329_v0, 0  ;;  %v1792_v19 = vld [vmem:[%s2256_s1 + $0x10] sm:$0xff] (!%p233_p10)   ;;  %v1793_v22 = vld [vmem:[%s2256_s1 + $0x18] sm:$0xff] (!%p233_p10)   ;;  %s271_s8 = sand.u32 (!%p233_p10), 1, %s1880_s19  }
  0x10   : > { %1655 = vmatpush3.bf16.msra.mxu0 (!%p233_p10), %v814_v2  ;;  %1622 = vmatprep.mubr.bf16.mxu1 (!%p233_p10), %v1788_v1  ;;  %v1796_v23 = vld [vmem:[%s2256_s1 + $0x20] sm:$0xff] (!%p233_p10)   ;;  %v1797_v26 = vld [vmem:[%s2256_s1 + $0x28] sm:$0xff] (!%p233_p10)   ;;  %v1800_v27 = vld [vmem:[%s2256_s1 + $0x30] sm:$0xff] (!%p233_p10)   ;;  %s1336_s9 = sshll.u32 (!%p233_p10), %s271_s8, 7  ;;  %s1898_s17 = smov (!%p233_p10), [#allocation2]  }
  0x11   : > { %v1801_v30 = vld [vmem:[%s2256_s1 + $0x38] sm:$0xff] (!%p233_p10)   ;;  %v1804_v31 = vld [vmem:[%s2256_s1 + $0x40] sm:$0xff] (!%p233_p10)   ;;  %v1805_v34 = vld [vmem:[%s2256_s1 + $0x48] sm:$0xff] (!%p233_p10)   ;;  %s2115_s10 = scalar_lea.vmem (!%p233_p10), [#allocation2], %s1336_s9 }
  0x12   : > { %v1808_v35 = vld [vmem:[%s2256_s1 + $0x50] sm:$0xff] (!%p233_p10)   ;;  %v1809_v37 = vld [vmem:[%s2256_s1 + $0x58] sm:$0xff] (!%p233_p10)   ;;  %v1812_v38 = vld [vmem:[%s2256_s1 + $0x60] sm:$0xff] (!%p233_p10)  }
  0x13   : > { %v1813_v39 = vld [vmem:[%s2256_s1 + $0x68] sm:$0xff] (!%p233_p10)   ;;  %v1816_v40 = vld [vmem:[%s2256_s1 + $0x70] sm:$0xff] (!%p233_p10)   ;;  %v1817_v41 = vld [vmem:[%s2256_s1 + $0x78] sm:$0xff] (!%p233_p10)  }
  0x14   : > { %v2094_v55 = vld [vmem:[%s2259_s4] ss:$0 sm:$0xff] (!%p233_p10) }
  0x16   : > { %s276_s11 = scalar_select %p275_p11, %s1888_s21, 1 }
  0x18   : > { %s1436_s12 = sshll.u32 %s276_s11, 6  ;;  %s1435_s16 = sshll.u32 %s276_s11, 7 }
  0x19   : > { %s1997_s15 = scalar_lea.vmem %s2257_s2, %s1436_s12  ;;  %s2005_s25 = scalar_lea.vmem %s2255_s0, %s1435_s16 }
  0x1a   : > { %v1778_v3 = vld [vmem:[%s1997_s15] sm:$0xff]   ;;  %v1779_v4 = vld [vmem:[%s1997_s15 + $0x8] sm:$0xff]   ;;  %v1780_v5 = vld [vmem:[%s1997_s15 + $0x10] sm:$0xff]   ;;  %s1469_s11 = sshll.u32 %s1888_s21, 11  ;;  %s1224_s12 = sshll.u32 %s2115_s10, 4  ;;  %s2203_s12 = int_to_ptr.vmem [resolvable:$true] %s1224_s12 }
  0x1b   : > { %1606 = vmatprep.subr.bf16.mxu1 %v1778_v3  ;;  %v1781_v6 = vld [vmem:[%s1997_s15 + $0x18] sm:$0xff]   ;;  %v1786_v7 = vld [vmem:[%s2005_s25] sm:$0xff]   ;;  %v1787_v8 = vld [vmem:[%s2005_s25 + $0x8] sm:$0xff]   ;;  %s2209_s21 = scalar_lea.sflag [#allocation3], %s271_s8  ;;  %s1818_s16 = scalar_lea.vmem %s2203_s12, 2048 }
  0x1c   : > { %1607 = vmatpush3.bf16.msra.mxu1 %v1778_v3  ;;  %1656 = vmatprep.mubr.msk.bf16.mxu0 %vm763_vm1, %v1786_v7  ;;  %v1790_v9 = vld [vmem:[%s2005_s25 + $0x10] sm:$0xff]   ;;  %v1782_v10 = vld [vmem:[%s1997_s15 + $0x20] sm:$0xff]   ;;  %v1783_v11 = vld [vmem:[%s1997_s15 + $0x28] sm:$0xff]   ;;  %p1819_p12 = scmp.ne.s32.totalorder %s2203_s12, %s1818_s16 }
  0x1d   : > { %1608 = vmatprep.subr.bf16.mxu1 %v1779_v4  ;;  %1657 = vmatmul.mubr.msk.bf16.vlgmr.msra.gmra.mrb[0].mxu0 %vm763_vm1, %v1787_v8  ;;  %v1791_v12 = vld [vmem:[%s2005_s25 + $0x18] sm:$0xff]   ;;  %v1794_v13 = vld [vmem:[%s2005_s25 + $0x20] sm:$0xff]   ;;  %v1784_v14 = vld [vmem:[%s1997_s15 + $0x30] sm:$0xff]  }
  0x1e   : > { %1660 = vmatprep.mubr.msk.bf16.mxu0 %vm763_vm1, %v1790_v9  ;;  %v1785_v15 = vld [vmem:[%s1997_s15 + $0x38] sm:$0xff]   ;;  %v1795_v16 = vld [vmem:[%s2005_s25 + $0x28] sm:$0xff]   ;;  %v1798_v17 = vld [vmem:[%s2005_s25 + $0x30] sm:$0xff]   ;;  %s2201_s15 = scalar_lea.hbm %s2260_s5, %s1469_s11  ;;  %p1820_p13 = pnand %p1819_p12, %p1971_p4 }
  0x1f   : > { %v1799_v20 = vld [vmem:[%s2005_s25 + $0x38] sm:$0xff]   ;;  %v1802_v21 = vld [vmem:[%s2005_s25 + $0x40] sm:$0xff]   ;;  %v1803_v24 = vld [vmem:[%s2005_s25 + $0x48] sm:$0xff]  }
  0x20   : > { %1609 = vmatpush3.bf16.msra.mxu1 %v1779_v4  ;;  %v1806_v25 = vld [vmem:[%s2005_s25 + $0x50] sm:$0xff]   ;;  %v1807_v28 = vld [vmem:[%s2005_s25 + $0x58] sm:$0xff]   ;;  %v1810_v29 = vld [vmem:[%s2005_s25 + $0x60] sm:$0xff]   ;;  %p1821_p0 = pneg %p1820_p13 }
  0x21   : > { %1610 = vmatprep.subr.bf16.mxu1 %v1780_v5  ;;  %v1811_v32 = vld [vmem:[%s2005_s25 + $0x68] sm:$0xff]   ;;  %v1814_v33 = vld [vmem:[%s2005_s25 + $0x70] sm:$0xff]   ;;  %v1815_v36 = vld [vmem:[%s2005_s25 + $0x78] sm:$0xff]   ;;  %s1822_s25 = sshll.u32 %s1898_s17, 4  ;;  %s1823_s25 = int_to_ptr.vmem [resolvable:$false] %s1822_s25 }
  0x22   : > { %s1824_s24 = scalar_lea.vmem %s1823_s25, 4096  ;;  %p1825_p1 = scmp.lt.s32.totalorder %s2203_s12, %s1823_s25 }
  0x23   : > { %p1826_p2 = scmp.lt.s32.totalorder %s1824_s24, %s1818_s16 }
  0x24   : > { %1611 = vmatpush3.bf16.msra.mxu1 %v1780_v5 }
  0x25   : > { %1612 = vmatprep.subr.bf16.mxu1 %v1781_v6  ;;  %1661 = vmatmul.mubr.msk.bf16.gmra.mrb[4].mxu0 %vm763_vm1, %v1791_v12  ;;  %p1827_p3 = por %p1826_p2, %p1825_p1 }
  0x26   : > { %1664 = vmatprep.mubr.msk.bf16.mxu0 %vm763_vm1, %v1794_v13 }
  0x27   : > { %p1828_p5 = pnand %p1827_p3, %p1821_p0 }
  0x28   : > { %1613 = vmatpush3.bf16.msra.mxu1 %v1781_v6 }
  0x29   : > { %1614 = vmatprep.subr.bf16.mxu1 %v1782_v10 }
  0x2c   : > { %1615 = vmatpush3.bf16.msra.mxu1 %v1782_v10 }
  0x2d   : > { %1616 = vmatprep.subr.bf16.mxu1 %v1783_v11  ;;  %1665 = vmatmul.mubr.msk.bf16.gmra.mrb[8].mxu0 %vm763_vm1, %v1795_v16 }
  0x2e   : > { %1668 = vmatprep.mubr.msk.bf16.mxu0 %vm763_vm1, %v1798_v17 }
  0x30   : > { %1617 = vmatpush3.bf16.msra.mxu1 %v1783_v11 }
  0x31   : > { %1618 = vmatprep.subr.bf16.mxu1 %v1784_v14 }
  0x34   : > { %1619 = vmatpush3.bf16.msra.mxu1 %v1784_v14 }
  0x35   : > { %1620 = vmatprep.subr.bf16.mxu1 %v1785_v15  ;;  %1669 = vmatmul.mubr.msk.bf16.gmra.mrb[12].mxu0 %vm763_vm1, %v1799_v20 }
  0x36   : > { %1672 = vmatprep.mubr.msk.bf16.mxu0 %vm763_vm1, %v1802_v21 }
  0x38   : > { %1621 = vmatpush3.bf16.msra.mxu1 %v1785_v15 }
  0x3b   : > { %1623 = vmatmul.mubr.bf16.vlgmr.msra.gmra.mrb[0].mxu1 %v1789_v18 }
  0x3c   : > { %1626 = vmatprep.mubr.bf16.mxu1 %v1792_v19 }
  0x3d   : > { %1673 = vmatmul.mubr.msk.bf16.gmra.mrb[16].mxu0 %vm763_vm1, %v1803_v24 }
  0x3e   : > { %1676 = vmatprep.mubr.msk.bf16.mxu0 %vm763_vm1, %v1806_v25 }
  0x43   : > { %1627 = vmatmul.mubr.bf16.gmra.mrb[4].mxu1 %v1793_v22 }
  0x44   : > { %1630 = vmatprep.mubr.bf16.mxu1 %v1796_v23 }
  0x45   : > { %1677 = vmatmul.mubr.msk.bf16.gmra.mrb[20].mxu0 %vm763_vm1, %v1807_v28 }
  0x46   : > { %1680 = vmatprep.mubr.msk.bf16.mxu0 %vm763_vm1, %v1810_v29 }
  0x4b   : > { %1631 = vmatmul.mubr.bf16.gmra.mrb[8].mxu1 %v1797_v26 }
  0x4c   : > { %1634 = vmatprep.mubr.bf16.mxu1 %v1800_v27 }
  0x4d   : > { %1681 = vmatmul.mubr.msk.bf16.gmra.mrb[24].mxu0 %vm763_vm1, %v1811_v32 }
  0x4e   : > { %1684 = vmatprep.mubr.msk.bf16.mxu0 %vm763_vm1, %v1814_v33 }
  0x53   : > { %1635 = vmatmul.mubr.bf16.gmra.mrb[12].mxu1 %v1801_v30 }
  0x54   : > { %1638 = vmatprep.mubr.bf16.mxu1 %v1804_v31 }
  0x55   : > { %1685 = vmatmul.mubr.msk.bf16.gmra.mrb[28].mxu0 %vm763_vm1, %v1815_v36 }
  0x5b   : > { %1639 = vmatmul.mubr.bf16.gmra.mrb[16].mxu1 %v1805_v34 }
  0x5c   : > { %1642 = vmatprep.mubr.bf16.mxu1 %v1808_v35 }
  0x63   : > { %1643 = vmatmul.mubr.bf16.gmra.mrb[20].mxu1 %v1809_v37 }
  0x64   : > { %1646 = vmatprep.mubr.bf16.mxu1 %v1812_v38 }
  0x6b   : > { %1647 = vmatmul.mubr.bf16.gmra.mrb[24].mxu1 %v1813_v39 }
  0x6c   : > { %1650 = vmatprep.mubr.bf16.mxu1 %v1816_v40 }
  0x73   : > { %1651 = vmatmul.mubr.bf16.gmra.mrb[28].mxu1 %v1817_v41 }
  0xf0   : > { %v1658_v42 = vpop.f32.mrb[0].mxu0 }
  0xf1   : > { %v850_v43 = vpop.f32.mrb[1].mxu0 }
  0xf2   : > { %v1659_v44 = vpop.f32.mrb[2].mxu0 }
  0xf3   : > { %v853_v45 = vpop.f32.mrb[3].mxu0 }
  0xf8   : > { %v1662_v46 = vpop.f32.mrb[4].mxu0 }
  0xf9   : > { %v866_v47 = vpop.f32.mrb[5].mxu0 }
  0xfa   : > { %v1663_v48 = vpop.f32.mrb[6].mxu0 }
  0xfb   : > { %v869_v49 = vpop.f32.mrb[7].mxu0 }
 0x100   : > { %v1666_v50 = vpop.f32.mrb[8].mxu0 }
 0x101   : > { %v882_v51 = vpop.f32.mrb[9].mxu0 }
 0x102   : > { %v1667_v52 = vpop.f32.mrb[10].mxu0 }
 0x103   : > { %v2089_v53 = vpop.f32.mrb[11].mxu0 }
 0x108   : > { %v2096_v58 = vpop.f32.mrb[12].mxu0 }
 0x109   : > { %v2099_v61 = vpop.f32.mrb[13].mxu0 }
 0x10a   : > { %v2102_v1 = vpop.f32.mrb[14].mxu0 }
 0x10b   : > { %v2105_v4 = vpop.f32.mrb[15].mxu0 }
 0x10e   : > { %v1624_v54 = vpop.f32.mrb[0].mxu1 }
 0x10f   : > { %v859_v56 = vadd.f32 %v1658_v42, %v1624_v54  ;;  %v556_v57 = vpop.f32.mrb[1].mxu1 }
 0x110   : > { %v851_v59 = vadd.f32 %v850_v43, %v556_v57  ;;  %v1625_v60 = vpop.f32.mrb[2].mxu1  ;;  %v2111_v15 = vpop.f32.mrb[16].mxu0 }
 0x111   : > { %v986_v62 = vadd.f32 %v2094_v55, %v859_v56  ;;  %v862_v63 = vadd.f32 %v1659_v44, %v1625_v60  ;;  %v559_v0 = vpop.f32.mrb[3].mxu1  ;;  %v2113_v19 = vpop.f32.mrb[17].mxu0 }
 0x112   : > { %v984_v2 = vadd.f32 %v2094_v55, %v851_v59  ;;  %v854_v3 = vadd.f32 %v853_v45, %v559_v0  ;;  %v2119_v23 = vpop.f32.mrb[18].mxu0 }
 0x113   : > { %v987_v5 = vadd.f32 %v2094_v55, %v862_v63  ;;  %v1018_v7 = vmax.f32 %v986_v62, 0.0  ;;  %v2123_v26 = vpop.f32.mrb[19].mxu0 }
 0x114   : > { %v985_v6 = vadd.f32 %v2094_v55, %v854_v3  ;;  %v1016_v9 = vmax.f32 %v984_v2, 0.0 }
 0x115   : > { %v1019_v8 = vmax.f32 %v987_v5, 0.0 }
 0x116   : > { %v1017_v10 = vmax.f32 %v985_v6, 0.0  ;;  %v1628_v11 = vpop.f32.mrb[4].mxu1 }
 0x117   : > { %v1478_v12 = vpack.c.bf16 %v1019_v8, %v1018_v7  ;;  %v875_v13 = vadd.f32 %v1662_v46, %v1628_v11  ;;  %v572_v14 = vpop.f32.mrb[5].mxu1 }
 0x118   : > { %v1473_v16 = vpack.c.bf16 %v1017_v10, %v1016_v9  ;;  %v867_v17 = vadd.f32 %v866_v47, %v572_v14  ;;  %v1629_v18 = vpop.f32.mrb[6].mxu1  ;;  %v2127_v37 = vpop.f32.mrb[20].mxu0 }
 0x119   : > { %1550 = vst [vmem:[%s2115_s10 + $0x8] sm:$0xff] %v1478_v12   ;;  %v990_v20 = vadd.f32 %v2094_v55, %v875_v13  ;;  %v878_v21 = vadd.f32 %v1663_v48, %v1629_v18  ;;  %v575_v22 = vpop.f32.mrb[7].mxu1  ;;  %v2129_v41 = vpop.f32.mrb[21].mxu0 }
 0x11a   : > { %1474 = vst [vmem:[%s2115_s10] sm:$0xff] %v1473_v16   ;;  %v988_v24 = vadd.f32 %v2094_v55, %v867_v17  ;;  %v870_v25 = vadd.f32 %v869_v49, %v575_v22  ;;  %v2133_v45 = vpop.f32.mrb[22].mxu0 }
 0x11b   : > { %v991_v27 = vadd.f32 %v2094_v55, %v878_v21  ;;  %v1022_v29 = vmax.f32 %v990_v20, 0.0  ;;  %v2138_v48 = vpop.f32.mrb[23].mxu0 }
 0x11c   : > { %v989_v28 = vadd.f32 %v2094_v55, %v870_v25  ;;  %v1020_v31 = vmax.f32 %v988_v24, 0.0 }
 0x11d   : > { %v1023_v30 = vmax.f32 %v991_v27, 0.0 }
 0x11e   : > { %v1021_v32 = vmax.f32 %v989_v28, 0.0  ;;  %v1632_v33 = vpop.f32.mrb[8].mxu1 }
 0x11f   : > { %v1488_v34 = vpack.c.bf16 %v1023_v30, %v1022_v29  ;;  %v891_v35 = vadd.f32 %v1666_v50, %v1632_v33  ;;  %v588_v36 = vpop.f32.mrb[9].mxu1 }
 0x120   : > { %v1483_v38 = vpack.c.bf16 %v1021_v32, %v1020_v31  ;;  %v883_v39 = vadd.f32 %v882_v51, %v588_v36  ;;  %v1633_v40 = vpop.f32.mrb[10].mxu1  ;;  %v2143_v63 = vpop.f32.mrb[24].mxu0 }
 0x121   : > { %1552 = vst [vmem:[%s2115_s10 + $0x18] sm:$0xff] %v1488_v34   ;;  %v994_v42 = vadd.f32 %v2094_v55, %v891_v35  ;;  %v894_v43 = vadd.f32 %v1667_v52, %v1633_v40  ;;  %v591_v44 = vpop.f32.mrb[11].mxu1  ;;  %v2146_v3 = vpop.f32.mrb[25].mxu0 }
 0x122   : > { %1551 = vst [vmem:[%s2115_s10 + $0x10] sm:$0xff] %v1483_v38   ;;  %v992_v46 = vadd.f32 %v2094_v55, %v883_v39  ;;  %v886_v47 = vadd.f32 %v2089_v53, %v591_v44  ;;  %v2151_v8 = vpop.f32.mrb[26].mxu0 }
 0x123   : > { %v995_v49 = vadd.f32 %v2094_v55, %v894_v43  ;;  %v1026_v51 = vmax.f32 %v994_v42, 0.0  ;;  %v2156_v10 = vpop.f32.mrb[27].mxu0 }
 0x124   : > { %v993_v50 = vadd.f32 %v2094_v55, %v886_v47  ;;  %v1024_v56 = vmax.f32 %v992_v46, 0.0 }
 0x125   : > { %v1027_v54 = vmax.f32 %v995_v49, 0.0 }
 0x126   : > { %v1025_v52 = vmax.f32 %v993_v50, 0.0  ;;  %v1636_v57 = vpop.f32.mrb[12].mxu1 }
 0x127   : > { %v1498_v59 = vpack.c.bf16 %v1027_v54, %v1026_v51  ;;  %v907_v60 = vadd.f32 %v2096_v58, %v1636_v57  ;;  %v604_v62 = vpop.f32.mrb[13].mxu1 }
 0x128   : > { %v1493_v53 = vpack.c.bf16 %v1025_v52, %v1024_v56  ;;  %v899_v0 = vadd.f32 %v2099_v61, %v604_v62  ;;  %v1637_v2 = vpop.f32.mrb[14].mxu1  ;;  %v1686_v21 = vpop.f32.mrb[28].mxu0 }
 0x129   : > { %1554 = vst [vmem:[%s2115_s10 + $0x28] sm:$0xff] %v1498_v59   ;;  %v998_v5 = vadd.f32 %v2094_v55, %v907_v60  ;;  %v910_v6 = vadd.f32 %v2102_v1, %v1637_v2  ;;  %v607_v7 = vpop.f32.mrb[15].mxu1  ;;  %v962_v25 = vpop.f32.mrb[29].mxu0 }
 0x12a   : > { %1553 = vst [vmem:[%s2115_s10 + $0x20] sm:$0xff] %v1493_v53   ;;  %v996_v58 = vadd.f32 %v2094_v55, %v899_v0  ;;  %v902_v9 = vadd.f32 %v2105_v4, %v607_v7  ;;  %v1687_v30 = vpop.f32.mrb[30].mxu0 }
 0x12b   : > { %v999_v61 = vadd.f32 %v2094_v55, %v910_v6  ;;  %v1030_v12 = vmax.f32 %v998_v5, 0.0  ;;  %v965_v32 = vpop.f32.mrb[31].mxu0 }
 0x12c   : > { %v997_v11 = vadd.f32 %v2094_v55, %v902_v9  ;;  %v1028_v14 = vmax.f32 %v996_v58, 0.0 }
 0x12d   : > { %v1031_v13 = vmax.f32 %v999_v61, 0.0 }
 0x12e   : > { %v1029_v1 = vmax.f32 %v997_v11, 0.0  ;;  %v1640_v16 = vpop.f32.mrb[16].mxu1 }
 0x12f   : > { %v1508_v17 = vpack.c.bf16 %v1031_v13, %v1030_v12  ;;  %v923_v18 = vadd.f32 %v2111_v15, %v1640_v16  ;;  %v620_v20 = vpop.f32.mrb[17].mxu1 }
 0x130   : > { %v1503_v22 = vpack.c.bf16 %v1029_v1, %v1028_v14  ;;  %v915_v4 = vadd.f32 %v2113_v19, %v620_v20  ;;  %v1641_v24 = vpop.f32.mrb[18].mxu1 }
 0x131   : > { %1556 = vst [vmem:[%s2115_s10 + $0x38] sm:$0xff] %v1508_v17   ;;  %v1002_v27 = vadd.f32 %v2094_v55, %v923_v18  ;;  %v926_v28 = vadd.f32 %v2119_v23, %v1641_v24  ;;  %v623_v29 = vpop.f32.mrb[19].mxu1 }
 0x132   : > { %1555 = vst [vmem:[%s2115_s10 + $0x30] sm:$0xff] %v1503_v22   ;;  %v1000_v31 = vadd.f32 %v2094_v55, %v915_v4  ;;  %v918_v15 = vadd.f32 %v2123_v26, %v623_v29 }
 0x133   : > { %v1003_v33 = vadd.f32 %v2094_v55, %v926_v28  ;;  %v1034_v34 = vmax.f32 %v1002_v27, 0.0 }
 0x134   : > { %v1001_v19 = vadd.f32 %v2094_v55, %v918_v15  ;;  %v1032_v36 = vmax.f32 %v1000_v31, 0.0 }
 0x135   : > { %v1035_v35 = vmax.f32 %v1003_v33, 0.0 }
 0x136   : > { %v1033_v38 = vmax.f32 %v1001_v19, 0.0  ;;  %v1644_v39 = vpop.f32.mrb[20].mxu1 }
 0x137   : > { %v1518_v23 = vpack.c.bf16 %v1035_v35, %v1034_v34  ;;  %v939_v40 = vadd.f32 %v2127_v37, %v1644_v39  ;;  %v636_v42 = vpop.f32.mrb[21].mxu1 }
 0x138   : > { %v1513_v43 = vpack.c.bf16 %v1033_v38, %v1032_v36  ;;  %v931_v44 = vadd.f32 %v2129_v41, %v636_v42  ;;  %v1645_v46 = vpop.f32.mrb[22].mxu1 }
 0x139   : > { %1558 = vst [vmem:[%s2115_s10 + $0x48] sm:$0xff] %v1518_v23   ;;  %v1006_v26 = vadd.f32 %v2094_v55, %v939_v40  ;;  %v942_v47 = vadd.f32 %v2133_v45, %v1645_v46  ;;  %v639_v49 = vpop.f32.mrb[23].mxu1 }
 0x13a   : > { %1557 = vst [vmem:[%s2115_s10 + $0x40] sm:$0xff] %v1513_v43   ;;  %v1004_v50 = vadd.f32 %v2094_v55, %v931_v44  ;;  %v934_v51 = vadd.f32 %v2138_v48, %v639_v49 }
 0x13b   : > { %v1007_v54 = vadd.f32 %v2094_v55, %v942_v47  ;;  %v1038_v56 = vmax.f32 %v1006_v26, 0.0 }
 0x13c   : > { %v1005_v37 = vadd.f32 %v2094_v55, %v934_v51  ;;  %v1036_v52 = vmax.f32 %v1004_v50, 0.0 }
 0x13d   : > { %v1039_v41 = vmax.f32 %v1007_v54, 0.0 }
 0x13e   : > { %v1037_v57 = vmax.f32 %v1005_v37, 0.0  ;;  %v1648_v59 = vpop.f32.mrb[24].mxu1 }
 0x13f   : > { %v1528_v60 = vpack.c.bf16 %v1039_v41, %v1038_v56  ;;  %v955_v45 = vadd.f32 %v2143_v63, %v1648_v59  ;;  %v652_v62 = vpop.f32.mrb[25].mxu1 }
 0x140   : > { %v1523_v53 = vpack.c.bf16 %v1037_v57, %v1036_v52  ;;  %v947_v0 = vadd.f32 %v2146_v3, %v652_v62  ;;  %v1649_v2 = vpop.f32.mrb[26].mxu1 }
 0x141   : > { %1560 = vst [vmem:[%s2115_s10 + $0x58] sm:$0xff] %v1528_v60   ;;  %v1010_v48 = vadd.f32 %v2094_v55, %v955_v45  ;;  %v958_v5 = vadd.f32 %v2151_v8, %v1649_v2  ;;  %v655_v6 = vpop.f32.mrb[27].mxu1 }
 0x142   : > { %1559 = vst [vmem:[%s2115_s10 + $0x50] sm:$0xff] %v1523_v53   ;;  %v1008_v7 = vadd.f32 %v2094_v55, %v947_v0  ;;  %v950_v58 = vadd.f32 %v2156_v10, %v655_v6 }
 0x143   : > { %v1011_v9 = vadd.f32 %v2094_v55, %v958_v5  ;;  %v1042_v61 = vmax.f32 %v1010_v48, 0.0 }
 0x144   : > { %v1009_v63 = vadd.f32 %v2094_v55, %v950_v58  ;;  %v1040_v11 = vmax.f32 %v1008_v7, 0.0 }
 0x145   : > { %v1043_v3 = vmax.f32 %v1011_v9, 0.0 }
 0x146   : > { %v1041_v12 = vmax.f32 %v1009_v63, 0.0  ;;  %v1652_v13 = vpop.f32.mrb[28].mxu1 }
 0x147   : > { %v1538_v14 = vpack.c.bf16 %v1043_v3, %v1042_v61  ;;  %v971_v8 = vadd.f32 %v1686_v21, %v1652_v13  ;;  %v668_v1 = vpop.f32.mrb[29].mxu1 }
 0x148   : > { %v1533_v16 = vpack.c.bf16 %v1041_v12, %v1040_v11  ;;  %v963_v17 = vadd.f32 %v962_v25, %v668_v1  ;;  %v1653_v18 = vpop.f32.mrb[30].mxu1 }
 0x149   : > { %1562 = vst [vmem:[%s2115_s10 + $0x68] sm:$0xff] %v1538_v14   ;;  %v1014_v10 = vadd.f32 %v2094_v55, %v971_v8  ;;  %v974_v20 = vadd.f32 %v1687_v30, %v1653_v18  ;;  %v671_v22 = vpop.f32.mrb[31].mxu1 }
 0x14a   : > { %1561 = vst [vmem:[%s2115_s10 + $0x60] sm:$0xff] %v1533_v16   ;;  %v1012_v4 = vadd.f32 %v2094_v55, %v963_v17  ;;  %v966_v24 = vadd.f32 %v965_v32, %v671_v22 }
 0x14b   : > { %v1015_v27 = vadd.f32 %v2094_v55, %v974_v20  ;;  %v1046_v25 = vmax.f32 %v1014_v10, 0.0 }
 0x14c   : > { %v1013_v21 = vadd.f32 %v2094_v55, %v966_v24  ;;  %v1044_v29 = vmax.f32 %v1012_v4, 0.0 }
 0x14d   : > { %v1047_v28 = vmax.f32 %v1015_v27, 0.0 }
 0x14e   : > { %v1045_v31 = vmax.f32 %v1013_v21, 0.0 }
 0x14f   : > { %v1548_v30 = vpack.c.bf16 %v1047_v28, %v1046_v25 }
 0x150   : > { %v1543_v15 = vpack.c.bf16 %v1045_v31, %v1044_v29 }
 0x151   : > { %1564 = vst [vmem:[%s2115_s10 + $0x78] sm:$0xff] %v1548_v30  }
 0x152   : > { %1563 = vst [vmem:[%s2115_s10 + $0x70] sm:$0xff] %v1543_v15  }
 0x153   : > { %1831 = shalt.err (!%p1828_p5)
}
 0x154   : > { %s1832_s27 = scalar_lea.hbm %s2201_s15, 2048  ;;  %s1836_s8 = scalar_lea.hbm %s2260_s5, 4096 }
 0x155   : > { %p1833_p6 = scmp.ne.s32.totalorder %s2201_s15, %s1832_s27  ;;  %p1837_p10 = scmp.lt.u32.totalorder %s2201_s15, %s2260_s5 }
 0x156   : > { %p1838_p11 = scmp.lt.u32.totalorder %s1836_s8, %s1832_s27  ;;  %p1840_p13 = scmp.lt.u32.totalorder %s1832_s27, %s2201_s15 }
 0x157   : > { %p1834_p7 = pnand %p1833_p6, %p1971_p4 }
 0x158   : > { %p1839_p12 = por %p1838_p11, %p1837_p10 }
 0x159   : > { %p1835_p9 = pneg %p1834_p7 }
 0x15a   : > { %p1841_p0 = por %p1840_p13, %p1839_p12 }
 0x15c   : > { %p1842_p1 = pnand %p1841_p0, %p1835_p9 }
 0x15e   : > { %1845 = shalt.err (!%p1842_p1)
}
 0x15f   : > { %s1899_s11 = smov 64   ;;  %s1900_s13 = smov 4  }
 0x160   : > { %1721 = dma.vmem_to_hbm [thread:$0]  (%p1971_p4), %s2203_s12, 2048, %s2201_s15, %s2209_s21, %s1899_s11, %s1899_s11, %s1900_s13  }
 0x161 PF: > { %p1727_p2 = scmp.ge.s32.totalorder %s1896_s23, 2  ;;  %s1239_s14 = sand.u32 1, %s1876_s18  }
 0x162   : > { %s1240_s16 = scalar_lea.sflag [#allocation3], %s1239_s14 }
 0x163   : > { %p1724_p3 = pnand %p1727_p2, %p1978_p8 }
 0x165   : > { %1871 = dma.done.wait (!%p1724_p3), %s1240_s16, 2048  }
 0x166   : > { %1873 = vsyncadd (!%p1724_p3), %s1240_s16, 4294965248  ;;  %s18_s23 = sadd.s32 1, %s1896_s23   ;;  %s2263_s18 = smov %s1880_s19 }
 0x167   : > { %p15_p5 = scmp.ge.s32.totalorder %s18_s23, 4   ;;  %s2264_s19 = smov %s1884_s20 }
 0x168   : > { %s2265_s20 = smov %s1984_s6  ;;  %s2266_s21 = smov %s1892_s22 }
 0x169   : > { %s2267_s22 = smov %s2269_s26  ;;  %17 = sbr.rel (!%p15_p5) target bundleno = 4 (0x4), region = 81 }
 0x170   :  { %1245 = vsyncpa [#allocation3], 1 }
 0x171   :  { %1247 = vsyncpa [#allocation3 + $0x1], 1 }

</bundles_post_ra>
